<compile_context>
chip_gen: v6e
topology: v6e:2x2x1
jax: 0.10.0
libtpu: 0.0.40
codegen_flags: <defaults>
</compile_context>

<pallas_src>
import functools

import numpy as np

import jax
import jax.numpy as jnp
from jax.experimental import pallas as pl
from jax.experimental.pallas import tpu as pltpu


def _layer_norm(x, g, b, eps):
    mu = jnp.mean(x, axis=-1, keepdims=True)
    xc = x - mu
    var = jnp.mean(xc * xc, axis=-1, keepdims=True)
    return xc * jax.lax.rsqrt(var + eps) * g + b


def _encoder_layer_kernel(enc_ref, tgt_ref,
                          wq_ref, bq_ref, wkv_ref, bkv_ref,
                          hsum_ref, hexp_ref,
                          wfc_ref, bfc_ref, ln1g_ref, ln1b_ref,
                          w1_ref, b1_ref, w2_ref, b2_ref, ln2g_ref, ln2b_ref,
                          out_ref, attn_ref,
                          *, n_head, d_k, d_v, eps):
    Bc, L, D = enc_ref.shape                 # batch chunk handled by this grid step
    H = n_head
    hdk = H * d_k
    hdv = H * d_v
    mm_dtype = wq_ref.dtype                  # MXU operand dtype (bf16/f32), f32 accum

    # Hoisted casts: each activation slab is cast to the matmul dtype exactly once.
    enc = enc_ref[...].reshape(Bc * L, D).astype(mm_dtype)   # (Bc*L, D)
    tgt = tgt_ref[...]                                       # (Bc, D) f32 (residual path)

    # ---- Q projection and fused K/V projection (one MXU pass over enc each) ----
    q = jnp.dot(tgt.astype(mm_dtype), wq_ref[...],
                preferred_element_type=jnp.float32) + bq_ref[...]        # (Bc, hdk)
    kv = jnp.dot(enc, wkv_ref[...],
                 preferred_element_type=jnp.float32) + bkv_ref[...]      # (Bc*L, hdk+hdv)
    k = kv[:, :hdk]                                                      # (Bc*L, hdk)
    v = kv[:, hdk:]                                                      # (Bc*L, hdv)

    # 1/sqrt(d_k) applied in f32 on the small q slab (head_sum stays exact 0/1).
    q = q * jnp.float32(1.0 / (d_k ** 0.5))

    # ---- fused-head logits: (q*k) elementwise, block-diagonal head-sum matmul ----
    k3 = k.reshape(Bc, L, hdk)
    qk = (q[:, None, :] * k3).reshape(Bc * L, hdk)                       # (Bc*L, hdk) f32
    logits = jnp.dot(qk.astype(mm_dtype), hsum_ref[...],
                     preferred_element_type=jnp.float32)                 # (Bc*L, H)
    logits = logits.reshape(Bc, L, H)

    # ---- softmax over L (per sample, per head), f32 ----
    m = jnp.max(logits, axis=1, keepdims=True)                           # (Bc, 1, H)
    e = jnp.exp(logits - m)
    denom = jnp.sum(e, axis=1, keepdims=True)                            # (Bc, 1, H), >= 1
    r = pl.reciprocal(denom, approx=True)
    r = r * (2.0 - denom * r)        # one Newton step; safe because denom >= 1
    attn = e * r                                                         # (Bc, L, H)

    # ---- fused-head weighted sum of V ----
    attn_flat = attn.reshape(Bc * L, H)
    attn_exp = jnp.dot(attn_flat.astype(mm_dtype), hexp_ref[...],
                       preferred_element_type=jnp.float32)               # (Bc*L, hdv)
    concat = (attn_exp * v).reshape(Bc, L, hdv).sum(axis=1)              # (Bc, hdv)

    # ---- output projection + residual + LayerNorm ----
    fc = jnp.dot(concat.astype(mm_dtype), wfc_ref[...],
                 preferred_element_type=jnp.float32) + bfc_ref[...]      # (Bc, D)
    x1 = _layer_norm(fc + tgt, ln1g_ref[...], ln1b_ref[...], eps)

    # ---- position-wise feed forward (Conv1d k=1 == per-token linear) ----
    h1 = jnp.maximum(jnp.dot(x1.astype(mm_dtype), w1_ref[...],
                             preferred_element_type=jnp.float32) + b1_ref[...], 0.0)
    h2 = jnp.dot(h1.astype(mm_dtype), w2_ref[...],
                 preferred_element_type=jnp.float32) + b2_ref[...]
    x2 = _layer_norm(h2 + x1, ln2g_ref[...], ln2b_ref[...], eps)

    out_ref[...] = x2.astype(out_ref.dtype)                              # (Bc, D)

    # torch attn layout written in-kernel: (H, Bc*L) slab == (h*B + b, l) row order.
    attn_ref[...] = jnp.transpose(attn_flat).astype(attn_ref.dtype)      # (H, Bc*L)


def _resident_spec(shape):
    """Full-array block with a constant index_map: DMA'd once, stays resident."""
    nd = len(shape)
    return pl.BlockSpec(shape, lambda i, _nd=nd: (0,) * _nd)


def encoder_layer(enc_input, target_emb, params, *, n_head, d_k, d_v,
                  eps=1e-5, matmul_dtype=jnp.bfloat16, batch_block=None):
    B, L, D = enc_input.shape
    hdk, hdv = n_head * d_k, n_head * d_v
    d_inner = params["w1"].shape[1]

    bB = B if batch_block is None else batch_block
    assert B % bB == 0, "batch_block must divide the batch size"
    num_blocks = B // bB

    # Weights in the MXU operand dtype (bf16 by default); biases / LN params stay f32.
    wq = params["wq"].astype(matmul_dtype)
    wkv = jnp.concatenate([params["wk"], params["wv"]], axis=1).astype(matmul_dtype)
    bkv = jnp.concatenate([params["bk"], params["bv"]], axis=1)
    wfc = params["wfc"].astype(matmul_dtype)
    w1 = params["w1"].astype(matmul_dtype)
    w2 = params["w2"].astype(matmul_dtype)

    # Head-fusion matrices built at trace time (exact 0/1 entries, a few KB each).
    head_sum = jnp.asarray(np.kron(np.eye(n_head), np.ones((d_k, 1))), dtype=matmul_dtype)   # (hdk, H)
    head_expand = jnp.asarray(np.kron(np.eye(n_head), np.ones((1, d_v))), dtype=matmul_dtype)  # (H, hdv)

    weight_args = (wq, params["bq"], wkv, bkv, head_sum, head_expand,
                   wfc, params["bfc"], params["ln1g"], params["ln1b"],
                   w1, params["b1"], w2, params["b2"], params["ln2g"], params["ln2b"])

    kernel = functools.partial(_encoder_layer_kernel,
                               n_head=n_head, d_k=d_k, d_v=d_v, eps=eps)

    in_specs = [
        pl.BlockSpec((bB, L, D), lambda i: (i, 0, 0)),   # enc_input, batch-chunked
        pl.BlockSpec((bB, D), lambda i: (i, 0)),         # target_emb, batch-chunked
    ] + [_resident_spec(a.shape) for a in weight_args]

    out_specs = (
        pl.BlockSpec((bB, D), lambda i: (i, 0)),
        pl.BlockSpec((n_head, bB * L), lambda i: (0, i)),
    )

    # Advisory cost estimate so XLA schedules neighbouring ops around the (latency-
    # bound at small sizes) kernel.
    flops = 2 * (B * D * hdk
                 + B * L * D * (hdk + hdv)
                 + B * L * hdk * n_head
                 + B * L * n_head * hdv
                 + B * hdv * D
                 + B * D * d_inner
                 + B * d_inner * D)
    transcendentals = B * L * n_head + B * n_head + 2 * B
    bytes_accessed = (enc_input.size * enc_input.dtype.itemsize
                      + target_emb.size * target_emb.dtype.itemsize
                      + sum(a.size * a.dtype.itemsize for a in weight_args)
                      + B * D * 4 + n_head * B * L * 4)

    enc_out, attn = pl.pallas_call(
        kernel,
        out_shape=(jax.ShapeDtypeStruct((B, D), jnp.float32),
                   jax.ShapeDtypeStruct((n_head, B * L), jnp.float32)),
        grid=(num_blocks,),
        in_specs=in_specs,
        out_specs=out_specs,
        compiler_params=pltpu.CompilerParams(dimension_semantics=("parallel",)),
        cost_estimate=pl.CostEstimate(flops=int(flops),
                                      transcendentals=int(transcendentals),
                                      bytes_accessed=int(bytes_accessed)),
    )(enc_input, target_emb, *weight_args)

    # Free metadata reshapes only — the kernel already wrote the torch ordering.
    enc_out = enc_out.reshape(B, 1, D)                  # torch: (B, 1, d_model)
    enc_attn = attn.reshape(n_head * B, 1, L)           # torch: (n_head*B, 1, L), h*B + b
    return enc_out, enc_attn


def _reference(enc_input, target_emb, p, *, n_head, d_k, d_v, eps=1e-5):
    B, L, D = enc_input.shape
    tgt = target_emb[:, None, :]
    q = tgt @ p["wq"] + p["bq"]
    k = enc_input @ p["wk"] + p["bk"]
    v = enc_input @ p["wv"] + p["bv"]
    qh = q.reshape(B, 1, n_head, d_k).transpose(2, 0, 1, 3)
    kh = k.reshape(B, L, n_head, d_k).transpose(2, 0, 1, 3)
    vh = v.reshape(B, L, n_head, d_v).transpose(2, 0, 1, 3)
    logits = jnp.einsum("hbqd,hbkd->hbqk", qh, kh) / jnp.sqrt(jnp.float32(d_k))
    attn = jax.nn.softmax(logits, axis=-1)
    o = jnp.einsum("hbqk,hbkd->hbqd", attn, vh)
    o = o.transpose(1, 2, 0, 3).reshape(B, 1, n_head * d_v)
    o = o @ p["wfc"] + p["bfc"]
    x1 = _layer_norm(o + tgt, p["ln1g"], p["ln1b"], eps)
    h1 = jnp.maximum(x1 @ p["w1"] + p["b1"], 0.0)
    h2 = h1 @ p["w2"] + p["b2"]
    x2 = _layer_norm(h2 + x1, p["ln2g"], p["ln2b"], eps)
    return x2, attn.reshape(n_head * B, 1, L)


def _init_params(key, d_model, d_inner, n_head, d_k, d_v):
    ks = jax.random.split(key, 16)
    f32 = jnp.float32
    return {
        "wq": 0.1 * jax.random.normal(ks[0], (d_model, n_head * d_k), f32),
        "bq": 0.01 * jax.random.normal(ks[1], (1, n_head * d_k), f32),
        "wk": 0.1 * jax.random.normal(ks[2], (d_model, n_head * d_k), f32),
        "bk": 0.01 * jax.random.normal(ks[3], (1, n_head * d_k), f32),
        "wv": 0.1 * jax.random.normal(ks[4], (d_model, n_head * d_v), f32),
        "bv": 0.01 * jax.random.normal(ks[5], (1, n_head * d_v), f32),
        "wfc": 0.1 * jax.random.normal(ks[6], (n_head * d_v, d_model), f32),
        "bfc": 0.01 * jax.random.normal(ks[7], (1, d_model), f32),
        "ln1g": 1.0 + 0.1 * jax.random.normal(ks[8], (1, d_model), f32),
        "ln1b": 0.01 * jax.random.normal(ks[9], (1, d_model), f32),
        "w1": 0.1 * jax.random.normal(ks[10], (d_model, d_inner), f32),
        "b1": 0.01 * jax.random.normal(ks[11], (1, d_inner), f32),
        "w2": 0.1 * jax.random.normal(ks[12], (d_inner, d_model), f32),
        "b2": 0.01 * jax.random.normal(ks[13], (1, d_model), f32),
        "ln2g": 1.0 + 0.1 * jax.random.normal(ks[14], (1, d_model), f32),
        "ln2b": 0.01 * jax.random.normal(ks[15], (1, d_model), f32),
    }


if __name__ == "__main__":
    B, L, d_model, d_inner, n_head, d_k, d_v = 2, 8, 32, 64, 4, 8, 8

    root = jax.random.PRNGKey(0)
    k_enc, k_tgt, k_par = jax.random.split(root, 3)
    enc_input = jax.random.normal(k_enc, (B, L, d_model), jnp.float32)
    target_emb = jax.random.normal(k_tgt, (B, d_model), jnp.float32)
    params = _init_params(k_par, d_model, d_inner, n_head, d_k, d_v)

    ref_out, ref_attn = _reference(enc_input, target_emb, params,
                                   n_head=n_head, d_k=d_k, d_v=d_v)

    # f32 matmul path: bit-for-bit-ish check against the pure-JAX reference.
    out_f32, attn_f32 = encoder_layer(enc_input, target_emb, params,
                                      n_head=n_head, d_k=d_k, d_v=d_v,
                                      matmul_dtype=jnp.float32)
    out_f32 = jax.block_until_ready(out_f32)
    attn_f32 = jax.block_until_ready(attn_f32)

    # Default bf16 matmul path (f32 accumulation): looser tolerance vs f32 reference.
    out_bf16, attn_bf16 = encoder_layer(enc_input, target_emb, params,
                                        n_head=n_head, d_k=d_k, d_v=d_v)
    out_bf16 = jax.block_until_ready(out_bf16)
    attn_bf16 = jax.block_until_ready(attn_bf16)

    assert out_f32.shape == (B, 1, d_model)
    assert attn_f32.shape == (n_head * B, 1, L)
    assert jnp.allclose(out_f32, ref_out, atol=1e-4, rtol=1e-4)
    assert jnp.allclose(attn_f32, ref_attn, atol=1e-4, rtol=1e-4)
    assert jnp.allclose(out_bf16, ref_out, atol=5e-2, rtol=5e-2)
    assert jnp.allclose(attn_bf16, ref_attn, atol=5e-2, rtol=5e-2)
    print("KERNEL_OK")
</pallas_src>

<mosaic_0001>
module attributes {stable_mosaic.version = 11 : i64} {
  func.func @_encoder_layer_kernel(%arg0: i32, %arg1: memref<2x8x32xf32, #tpu.memory_space<vmem>>, %arg2: memref<2x32xf32, #tpu.memory_space<vmem>>, %arg3: memref<32x32xf32, #tpu.memory_space<vmem>>, %arg4: memref<1x32xf32, #tpu.memory_space<vmem>>, %arg5: memref<32x64xf32, #tpu.memory_space<vmem>>, %arg6: memref<1x64xf32, #tpu.memory_space<vmem>>, %arg7: memref<32x4xf32, #tpu.memory_space<vmem>>, %arg8: memref<4x32xf32, #tpu.memory_space<vmem>>, %arg9: memref<32x32xf32, #tpu.memory_space<vmem>>, %arg10: memref<1x32xf32, #tpu.memory_space<vmem>>, %arg11: memref<1x32xf32, #tpu.memory_space<vmem>>, %arg12: memref<1x32xf32, #tpu.memory_space<vmem>>, %arg13: memref<32x64xf32, #tpu.memory_space<vmem>>, %arg14: memref<1x64xf32, #tpu.memory_space<vmem>>, %arg15: memref<64x32xf32, #tpu.memory_space<vmem>>, %arg16: memref<1x32xf32, #tpu.memory_space<vmem>>, %arg17: memref<1x32xf32, #tpu.memory_space<vmem>>, %arg18: memref<1x32xf32, #tpu.memory_space<vmem>>, %arg19: memref<2x32xf32, #tpu.memory_space<vmem>>, %arg20: memref<4x16xf32, #tpu.memory_space<vmem>>) attributes {dimension_semantics = [#tpu.dimension_semantics<parallel>], iteration_bounds = array<i64: 1>, scalar_prefetch = 0 : i64, scratch_operands = 0 : i64, tpu.core_type = #tpu.core_type<tc>, window_params = [{transform_indices = @transform_0, window_bounds = array<i64: 2, 8, 32>}, {transform_indices = @transform_1, window_bounds = array<i64: 2, 32>}, {pipeline_mode = #tpu.pipeline_mode<synchronous>, transform_indices = @transform_2, window_bounds = array<i64: 32, 32>}, {pipeline_mode = #tpu.pipeline_mode<synchronous>, transform_indices = @transform_3, window_bounds = array<i64: 1, 32>}, {pipeline_mode = #tpu.pipeline_mode<synchronous>, transform_indices = @transform_4, window_bounds = array<i64: 32, 64>}, {pipeline_mode = #tpu.pipeline_mode<synchronous>, transform_indices = @transform_5, window_bounds = array<i64: 1, 64>}, {pipeline_mode = #tpu.pipeline_mode<synchronous>, transform_indices = @transform_6, window_bounds = array<i64: 32, 4>}, {pipeline_mode = #tpu.pipeline_mode<synchronous>, transform_indices = @transform_7, window_bounds = array<i64: 4, 32>}, {pipeline_mode = #tpu.pipeline_mode<synchronous>, transform_indices = @transform_8, window_bounds = array<i64: 32, 32>}, {pipeline_mode = #tpu.pipeline_mode<synchronous>, transform_indices = @transform_9, window_bounds = array<i64: 1, 32>}, {pipeline_mode = #tpu.pipeline_mode<synchronous>, transform_indices = @transform_10, window_bounds = array<i64: 1, 32>}, {pipeline_mode = #tpu.pipeline_mode<synchronous>, transform_indices = @transform_11, window_bounds = array<i64: 1, 32>}, {pipeline_mode = #tpu.pipeline_mode<synchronous>, transform_indices = @transform_12, window_bounds = array<i64: 32, 64>}, {pipeline_mode = #tpu.pipeline_mode<synchronous>, transform_indices = @transform_13, window_bounds = array<i64: 1, 64>}, {pipeline_mode = #tpu.pipeline_mode<synchronous>, transform_indices = @transform_14, window_bounds = array<i64: 64, 32>}, {pipeline_mode = #tpu.pipeline_mode<synchronous>, transform_indices = @transform_15, window_bounds = array<i64: 1, 32>}, {pipeline_mode = #tpu.pipeline_mode<synchronous>, transform_indices = @transform_16, window_bounds = array<i64: 1, 32>}, {pipeline_mode = #tpu.pipeline_mode<synchronous>, transform_indices = @transform_17, window_bounds = array<i64: 1, 32>}, {transform_indices = @transform_18, window_bounds = array<i64: 2, 32>}, {transform_indices = @transform_19, window_bounds = array<i64: 4, 16>}]} {
    %c0 = arith.constant 0 : index
    %c0_0 = arith.constant 0 : index
    %c0_1 = arith.constant 0 : index
    %0 = vector.load %arg1[%c0, %c0_0, %c0_1] : memref<2x8x32xf32, #tpu.memory_space<vmem>>, vector<2x8x32xf32>
    %1 = vector.shape_cast %0 : vector<2x8x32xf32> to vector<16x32xf32>
    %c0_2 = arith.constant 0 : index
    %c0_3 = arith.constant 0 : index
    %2 = vector.load %arg2[%c0_2, %c0_3] : memref<2x32xf32, #tpu.memory_space<vmem>>, vector<2x32xf32>
    %c0_4 = arith.constant 0 : index
    %c0_5 = arith.constant 0 : index
    %3 = vector.load %arg3[%c0_4, %c0_5] : memref<32x32xf32, #tpu.memory_space<vmem>>, vector<32x32xf32>
    %cst = arith.constant dense<0.000000e+00> : vector<2x32xf32>
    %4 = tpu.matmul %2, %3, %cst {dimension_numbers = #tpu.dot_dimension_numbers<[1], [0], [0], [1], [0, 0, 1, 1], [], []>} : vector<2x32xf32>, vector<32x32xf32>, vector<2x32xf32> -> vector<2x32xf32>
    %c0_6 = arith.constant 0 : index
    %c0_7 = arith.constant 0 : index
    %5 = vector.load %arg4[%c0_6, %c0_7] : memref<1x32xf32, #tpu.memory_space<vmem>>, vector<1x32xf32>
    %6 = vector.broadcast %5 : vector<1x32xf32> to vector<2x32xf32>
    %7 = arith.addf %4, %6 : vector<2x32xf32>
    %c0_8 = arith.constant 0 : index
    %c0_9 = arith.constant 0 : index
    %8 = vector.load %arg5[%c0_8, %c0_9] : memref<32x64xf32, #tpu.memory_space<vmem>>, vector<32x64xf32>
    %cst_10 = arith.constant dense<0.000000e+00> : vector<16x64xf32>
    %9 = tpu.matmul %1, %8, %cst_10 {dimension_numbers = #tpu.dot_dimension_numbers<[1], [0], [0], [1], [0, 0, 1, 1], [], []>} : vector<16x32xf32>, vector<32x64xf32>, vector<16x64xf32> -> vector<16x64xf32>
    %c0_11 = arith.constant 0 : index
    %c0_12 = arith.constant 0 : index
    %10 = vector.load %arg6[%c0_11, %c0_12] : memref<1x64xf32, #tpu.memory_space<vmem>>, vector<1x64xf32>
    %11 = vector.broadcast %10 : vector<1x64xf32> to vector<16x64xf32>
    %12 = arith.addf %9, %11 : vector<16x64xf32>
    %13 = vector.extract_strided_slice %12 {offsets = [0, 0], sizes = [16, 32], strides = [1, 1]} : vector<16x64xf32> to vector<16x32xf32>
    %14 = vector.extract_strided_slice %12 {offsets = [0, 32], sizes = [16, 32], strides = [1, 1]} : vector<16x64xf32> to vector<16x32xf32>
    %cst_13 = arith.constant 0.353553385 : f32
    %15 = vector.broadcast %cst_13 : f32 to vector<2x32xf32>
    %16 = arith.mulf %7, %15 : vector<2x32xf32>
    %17 = vector.shape_cast %13 : vector<16x32xf32> to vector<2x8x32xf32>
    %18 = vector.shape_cast %16 : vector<2x32xf32> to vector<2x1x32xf32>
    %19 = vector.broadcast %18 : vector<2x1x32xf32> to vector<2x8x32xf32>
    %20 = arith.mulf %19, %17 : vector<2x8x32xf32>
    %21 = vector.shape_cast %20 : vector<2x8x32xf32> to vector<16x32xf32>
    %c0_14 = arith.constant 0 : index
    %c0_15 = arith.constant 0 : index
    %22 = vector.load %arg7[%c0_14, %c0_15] : memref<32x4xf32, #tpu.memory_space<vmem>>, vector<32x4xf32>
    %cst_16 = arith.constant dense<0.000000e+00> : vector<16x4xf32>
    %23 = tpu.matmul %21, %22, %cst_16 {dimension_numbers = #tpu.dot_dimension_numbers<[1], [0], [0], [1], [0, 0, 1, 1], [], []>} : vector<16x32xf32>, vector<32x4xf32>, vector<16x4xf32> -> vector<16x4xf32>
    %24 = vector.shape_cast %23 : vector<16x4xf32> to vector<2x8x4xf32>
    %cst_17 = arith.constant dense<0xFF800000> : vector<2x4xf32>
    %25 = vector.multi_reduction <maximumf>, %24, %cst_17 [1] : vector<2x8x4xf32> to vector<2x4xf32>
    %26 = vector.shape_cast %25 : vector<2x4xf32> to vector<2x1x4xf32>
    %27 = vector.broadcast %26 : vector<2x1x4xf32> to vector<2x8x4xf32>
    %28 = arith.subf %24, %27 : vector<2x8x4xf32>
    %29 = math.exp %28 : vector<2x8x4xf32>
    %cst_18 = arith.constant dense<0.000000e+00> : vector<2x4xf32>
    %30 = vector.multi_reduction <add>, %29, %cst_18 [1] : vector<2x8x4xf32> to vector<2x4xf32>
    %31 = vector.shape_cast %30 : vector<2x4xf32> to vector<2x1x4xf32>
    %32 = tpu.reciprocal %31 {approx = true} : vector<2x1x4xf32> -> vector<2x1x4xf32>
    %33 = arith.mulf %31, %32 : vector<2x1x4xf32>
    %cst_19 = arith.constant 2.000000e+00 : f32
    %34 = vector.broadcast %cst_19 : f32 to vector<2x1x4xf32>
    %35 = arith.subf %34, %33 : vector<2x1x4xf32>
    %36 = arith.mulf %32, %35 : vector<2x1x4xf32>
    %37 = vector.broadcast %36 : vector<2x1x4xf32> to vector<2x8x4xf32>
    %38 = arith.mulf %29, %37 : vector<2x8x4xf32>
    %39 = vector.shape_cast %38 : vector<2x8x4xf32> to vector<16x4xf32>
    %c0_20 = arith.constant 0 : index
    %c0_21 = arith.constant 0 : index
    %40 = vector.load %arg8[%c0_20, %c0_21] : memref<4x32xf32, #tpu.memory_space<vmem>>, vector<4x32xf32>
    %cst_22 = arith.constant dense<0.000000e+00> : vector<16x32xf32>
    %41 = tpu.matmul %39, %40, %cst_22 {dimension_numbers = #tpu.dot_dimension_numbers<[1], [0], [0], [1], [0, 0, 1, 1], [], []>} : vector<16x4xf32>, vector<4x32xf32>, vector<16x32xf32> -> vector<16x32xf32>
    %42 = arith.mulf %41, %14 : vector<16x32xf32>
    %43 = vector.shape_cast %42 : vector<16x32xf32> to vector<2x8x32xf32>
    %cst_23 = arith.constant dense<0.000000e+00> : vector<2x32xf32>
    %44 = vector.multi_reduction <add>, %43, %cst_23 [1] : vector<2x8x32xf32> to vector<2x32xf32>
    %c0_24 = arith.constant 0 : index
    %c0_25 = arith.constant 0 : index
    %45 = vector.load %arg9[%c0_24, %c0_25] : memref<32x32xf32, #tpu.memory_space<vmem>>, vector<32x32xf32>
    %cst_26 = arith.constant dense<0.000000e+00> : vector<2x32xf32>
    %46 = tpu.matmul %44, %45, %cst_26 {dimension_numbers = #tpu.dot_dimension_numbers<[1], [0], [0], [1], [0, 0, 1, 1], [], []>} : vector<2x32xf32>, vector<32x32xf32>, vector<2x32xf32> -> vector<2x32xf32>
    %c0_27 = arith.constant 0 : index
    %c0_28 = arith.constant 0 : index
    %47 = vector.load %arg10[%c0_27, %c0_28] : memref<1x32xf32, #tpu.memory_space<vmem>>, vector<1x32xf32>
    %48 = vector.broadcast %47 : vector<1x32xf32> to vector<2x32xf32>
    %49 = arith.addf %46, %48 : vector<2x32xf32>
    %50 = arith.addf %49, %2 : vector<2x32xf32>
    %c0_29 = arith.constant 0 : index
    %c0_30 = arith.constant 0 : index
    %51 = vector.load %arg11[%c0_29, %c0_30] : memref<1x32xf32, #tpu.memory_space<vmem>>, vector<1x32xf32>
    %c0_31 = arith.constant 0 : index
    %c0_32 = arith.constant 0 : index
    %52 = vector.load %arg12[%c0_31, %c0_32] : memref<1x32xf32, #tpu.memory_space<vmem>>, vector<1x32xf32>
    %cst_33 = arith.constant dense<0.000000e+00> : vector<2xf32>
    %53 = vector.multi_reduction <add>, %50, %cst_33 [1] : vector<2x32xf32> to vector<2xf32>
    %54 = vector.shape_cast %53 : vector<2xf32> to vector<2x1xf32>
    %cst_34 = arith.constant 3.200000e+01 : f32
    %55 = vector.broadcast %cst_34 : f32 to vector<2x1xf32>
    %56 = arith.divf %54, %55 : vector<2x1xf32>
    %57 = vector.broadcast %56 : vector<2x1xf32> to vector<2x32xf32>
    %58 = arith.subf %50, %57 : vector<2x32xf32>
    %59 = arith.mulf %58, %58 : vector<2x32xf32>
    %cst_35 = arith.constant dense<0.000000e+00> : vector<2xf32>
    %60 = vector.multi_reduction <add>, %59, %cst_35 [1] : vector<2x32xf32> to vector<2xf32>
    %61 = vector.shape_cast %60 : vector<2xf32> to vector<2x1xf32>
    %cst_36 = arith.constant 3.200000e+01 : f32
    %62 = vector.broadcast %cst_36 : f32 to vector<2x1xf32>
    %63 = arith.divf %61, %62 : vector<2x1xf32>
    %cst_37 = arith.constant 9.99999974E-6 : f32
    %64 = vector.broadcast %cst_37 : f32 to vector<2x1xf32>
    %65 = arith.addf %63, %64 : vector<2x1xf32>
    %66 = math.rsqrt %65 : vector<2x1xf32>
    %67 = vector.broadcast %66 : vector<2x1xf32> to vector<2x32xf32>
    %68 = arith.mulf %58, %67 : vector<2x32xf32>
    %69 = vector.broadcast %51 : vector<1x32xf32> to vector<2x32xf32>
    %70 = arith.mulf %68, %69 : vector<2x32xf32>
    %71 = vector.broadcast %52 : vector<1x32xf32> to vector<2x32xf32>
    %72 = arith.addf %70, %71 : vector<2x32xf32>
    %c0_38 = arith.constant 0 : index
    %c0_39 = arith.constant 0 : index
    %73 = vector.load %arg13[%c0_38, %c0_39] : memref<32x64xf32, #tpu.memory_space<vmem>>, vector<32x64xf32>
    %cst_40 = arith.constant dense<0.000000e+00> : vector<2x64xf32>
    %74 = tpu.matmul %72, %73, %cst_40 {dimension_numbers = #tpu.dot_dimension_numbers<[1], [0], [0], [1], [0, 0, 1, 1], [], []>} : vector<2x32xf32>, vector<32x64xf32>, vector<2x64xf32> -> vector<2x64xf32>
    %c0_41 = arith.constant 0 : index
    %c0_42 = arith.constant 0 : index
    %75 = vector.load %arg14[%c0_41, %c0_42] : memref<1x64xf32, #tpu.memory_space<vmem>>, vector<1x64xf32>
    %76 = vector.broadcast %75 : vector<1x64xf32> to vector<2x64xf32>
    %77 = arith.addf %74, %76 : vector<2x64xf32>
    %cst_43 = arith.constant 0.000000e+00 : f32
    %78 = vector.broadcast %cst_43 : f32 to vector<2x64xf32>
    %79 = arith.maximumf %77, %78 : vector<2x64xf32>
    %c0_44 = arith.constant 0 : index
    %c0_45 = arith.constant 0 : index
    %80 = vector.load %arg15[%c0_44, %c0_45] : memref<64x32xf32, #tpu.memory_space<vmem>>, vector<64x32xf32>
    %cst_46 = arith.constant dense<0.000000e+00> : vector<2x32xf32>
    %81 = tpu.matmul %79, %80, %cst_46 {dimension_numbers = #tpu.dot_dimension_numbers<[1], [0], [0], [1], [0, 0, 1, 1], [], []>} : vector<2x64xf32>, vector<64x32xf32>, vector<2x32xf32> -> vector<2x32xf32>
    %c0_47 = arith.constant 0 : index
    %c0_48 = arith.constant 0 : index
    %82 = vector.load %arg16[%c0_47, %c0_48] : memref<1x32xf32, #tpu.memory_space<vmem>>, vector<1x32xf32>
    %83 = vector.broadcast %82 : vector<1x32xf32> to vector<2x32xf32>
    %84 = arith.addf %81, %83 : vector<2x32xf32>
    %85 = arith.addf %84, %72 : vector<2x32xf32>
    %c0_49 = arith.constant 0 : index
    %c0_50 = arith.constant 0 : index
    %86 = vector.load %arg17[%c0_49, %c0_50] : memref<1x32xf32, #tpu.memory_space<vmem>>, vector<1x32xf32>
    %c0_51 = arith.constant 0 : index
    %c0_52 = arith.constant 0 : index
    %87 = vector.load %arg18[%c0_51, %c0_52] : memref<1x32xf32, #tpu.memory_space<vmem>>, vector<1x32xf32>
    %cst_53 = arith.constant dense<0.000000e+00> : vector<2xf32>
    %88 = vector.multi_reduction <add>, %85, %cst_53 [1] : vector<2x32xf32> to vector<2xf32>
    %89 = vector.shape_cast %88 : vector<2xf32> to vector<2x1xf32>
    %cst_54 = arith.constant 3.200000e+01 : f32
    %90 = vector.broadcast %cst_54 : f32 to vector<2x1xf32>
    %91 = arith.divf %89, %90 : vector<2x1xf32>
    %92 = vector.broadcast %91 : vector<2x1xf32> to vector<2x32xf32>
    %93 = arith.subf %85, %92 : vector<2x32xf32>
    %94 = arith.mulf %93, %93 : vector<2x32xf32>
    %cst_55 = arith.constant dense<0.000000e+00> : vector<2xf32>
    %95 = vector.multi_reduction <add>, %94, %cst_55 [1] : vector<2x32xf32> to vector<2xf32>
    %96 = vector.shape_cast %95 : vector<2xf32> to vector<2x1xf32>
    %cst_56 = arith.constant 3.200000e+01 : f32
    %97 = vector.broadcast %cst_56 : f32 to vector<2x1xf32>
    %98 = arith.divf %96, %97 : vector<2x1xf32>
    %cst_57 = arith.constant 9.99999974E-6 : f32
    %99 = vector.broadcast %cst_57 : f32 to vector<2x1xf32>
    %100 = arith.addf %98, %99 : vector<2x1xf32>
    %101 = math.rsqrt %100 : vector<2x1xf32>
    %102 = vector.broadcast %101 : vector<2x1xf32> to vector<2x32xf32>
    %103 = arith.mulf %93, %102 : vector<2x32xf32>
    %104 = vector.broadcast %86 : vector<1x32xf32> to vector<2x32xf32>
    %105 = arith.mulf %103, %104 : vector<2x32xf32>
    %106 = vector.broadcast %87 : vector<1x32xf32> to vector<2x32xf32>
    %107 = arith.addf %105, %106 : vector<2x32xf32>
    %c0_58 = arith.constant 0 : index
    %c0_59 = arith.constant 0 : index
    %108 = vector.load %arg19[%c0_58, %c0_59] : memref<2x32xf32, #tpu.memory_space<vmem>>, vector<2x32xf32>
    tpu.vector_store %arg19[%c0_58, %c0_59], %107 {strides = array<i32>} : memref<2x32xf32, #tpu.memory_space<vmem>>, vector<2x32xf32>,
    %109 = tpu.transpose %39, [1, 0] : vector<16x4xf32> -> vector<4x16xf32>
    %c0_60 = arith.constant 0 : index
    %c0_61 = arith.constant 0 : index
    %110 = vector.load %arg20[%c0_60, %c0_61] : memref<4x16xf32, #tpu.memory_space<vmem>>, vector<4x16xf32>
    tpu.vector_store %arg20[%c0_60, %c0_61], %109 {strides = array<i32>} : memref<4x16xf32, #tpu.memory_space<vmem>>, vector<4x16xf32>,
    return
  }
  func.func @transform_0(%arg0: i32) -> (i32, i32, i32) {
    %c0_i32 = arith.constant 0 : i32
    %c0_i32_0 = arith.constant 0 : i32
    %c0_i32_1 = arith.constant 0 : i32
    return %arg0, %c0_i32, %c0_i32_0 : i32, i32, i32
  }
  func.func @transform_1(%arg0: i32) -> (i32, i32) {
    %c0_i32 = arith.constant 0 : i32
    %c0_i32_0 = arith.constant 0 : i32
    return %arg0, %c0_i32 : i32, i32
  }
  func.func @transform_2(%arg0: i32) -> (i32, i32) {
    %c0_i32 = arith.constant 0 : i32
    %c0_i32_0 = arith.constant 0 : i32
    %c0_i32_1 = arith.constant 0 : i32
    return %c0_i32, %c0_i32_0 : i32, i32
  }
  func.func @transform_3(%arg0: i32) -> (i32, i32) {
    %c0_i32 = arith.constant 0 : i32
    %c0_i32_0 = arith.constant 0 : i32
    %c0_i32_1 = arith.constant 0 : i32
    return %c0_i32, %c0_i32_0 : i32, i32
  }
  func.func @transform_4(%arg0: i32) -> (i32, i32) {
    %c0_i32 = arith.constant 0 : i32
    %c0_i32_0 = arith.constant 0 : i32
    %c0_i32_1 = arith.constant 0 : i32
    return %c0_i32, %c0_i32_0 : i32, i32
  }
  func.func @transform_5(%arg0: i32) -> (i32, i32) {
    %c0_i32 = arith.constant 0 : i32
    %c0_i32_0 = arith.constant 0 : i32
    %c0_i32_1 = arith.constant 0 : i32
    return %c0_i32, %c0_i32_0 : i32, i32
  }
  func.func @transform_6(%arg0: i32) -> (i32, i32) {
    %c0_i32 = arith.constant 0 : i32
    %c0_i32_0 = arith.constant 0 : i32
    %c0_i32_1 = arith.constant 0 : i32
    return %c0_i32, %c0_i32_0 : i32, i32
  }
  func.func @transform_7(%arg0: i32) -> (i32, i32) {
    %c0_i32 = arith.constant 0 : i32
    %c0_i32_0 = arith.constant 0 : i32
    %c0_i32_1 = arith.constant 0 : i32
    return %c0_i32, %c0_i32_0 : i32, i32
  }
  func.func @transform_8(%arg0: i32) -> (i32, i32) {
    %c0_i32 = arith.constant 0 : i32
    %c0_i32_0 = arith.constant 0 : i32
    %c0_i32_1 = arith.constant 0 : i32
    return %c0_i32, %c0_i32_0 : i32, i32
  }
  func.func @transform_9(%arg0: i32) -> (i32, i32) {
    %c0_i32 = arith.constant 0 : i32
    %c0_i32_0 = arith.constant 0 : i32
    %c0_i32_1 = arith.constant 0 : i32
    return %c0_i32, %c0_i32_0 : i32, i32
  }
  func.func @transform_10(%arg0: i32) -> (i32, i32) {
    %c0_i32 = arith.constant 0 : i32
    %c0_i32_0 = arith.constant 0 : i32
    %c0_i32_1 = arith.constant 0 : i32
    return %c0_i32, %c0_i32_0 : i32, i32
  }
  func.func @transform_11(%arg0: i32) -> (i32, i32) {
    %c0_i32 = arith.constant 0 : i32
    %c0_i32_0 = arith.constant 0 : i32
    %c0_i32_1 = arith.constant 0 : i32
    return %c0_i32, %c0_i32_0 : i32, i32
  }
  func.func @transform_12(%arg0: i32) -> (i32, i32) {
    %c0_i32 = arith.constant 0 : i32
    %c0_i32_0 = arith.constant 0 : i32
    %c0_i32_1 = arith.constant 0 : i32
    return %c0_i32, %c0_i32_0 : i32, i32
  }
  func.func @transform_13(%arg0: i32) -> (i32, i32) {
    %c0_i32 = arith.constant 0 : i32
    %c0_i32_0 = arith.constant 0 : i32
    %c0_i32_1 = arith.constant 0 : i32
    return %c0_i32, %c0_i32_0 : i32, i32
  }
  func.func @transform_14(%arg0: i32) -> (i32, i32) {
    %c0_i32 = arith.constant 0 : i32
    %c0_i32_0 = arith.constant 0 : i32
    %c0_i32_1 = arith.constant 0 : i32
    return %c0_i32, %c0_i32_0 : i32, i32
  }
  func.func @transform_15(%arg0: i32) -> (i32, i32) {
    %c0_i32 = arith.constant 0 : i32
    %c0_i32_0 = arith.constant 0 : i32
    %c0_i32_1 = arith.constant 0 : i32
    return %c0_i32, %c0_i32_0 : i32, i32
  }
  func.func @transform_16(%arg0: i32) -> (i32, i32) {
    %c0_i32 = arith.constant 0 : i32
    %c0_i32_0 = arith.constant 0 : i32
    %c0_i32_1 = arith.constant 0 : i32
    return %c0_i32, %c0_i32_0 : i32, i32
  }
  func.func @transform_17(%arg0: i32) -> (i32, i32) {
    %c0_i32 = arith.constant 0 : i32
    %c0_i32_0 = arith.constant 0 : i32
    %c0_i32_1 = arith.constant 0 : i32
    return %c0_i32, %c0_i32_0 : i32, i32
  }
  func.func @transform_18(%arg0: i32) -> (i32, i32) {
    %c0_i32 = arith.constant 0 : i32
    %c0_i32_0 = arith.constant 0 : i32
    return %arg0, %c0_i32 : i32, i32
  }
  func.func @transform_19(%arg0: i32) -> (i32, i32) {
    %c0_i32 = arith.constant 0 : i32
    %c0_i32_0 = arith.constant 0 : i32
    return %c0_i32, %arg0 : i32, i32
  }
}

</mosaic_0001>

<bundles_post_ra>
// kernel: tpu_custom_call.1
= control target key start
LH: loop header
LB: loop body
LE: loop exit
PB: predicated region body
PF: predicated region fallthrough
CT: control target
= control target key end

     0   :  { %s1434_s0 = inlined_call_operand.vmem [shape: f32[2,8,32], index: 0, kind: input, shape index: {}]   ;;  %s1435_s1 = inlined_call_operand.vmem [shape: f32[2,32], index: 1, kind: input, shape index: {}]   ;;  %s1436_s2 = inlined_call_operand.vmem [shape: f32[32,32], index: 2, kind: input, shape index: {}]   ;;  %s1437_s3 = inlined_call_operand.vmem [shape: f32[1,32], index: 3, kind: input, shape index: {}]   ;;  %s1438_s4 = inlined_call_operand.vmem [shape: f32[32,64], index: 4, kind: input, shape index: {}]   ;;  %s1439_s5 = inlined_call_operand.vmem [shape: f32[1,64], index: 5, kind: input, shape index: {}]   ;;  %s1440_s6 = inlined_call_operand.vmem [shape: f32[32,4], index: 6, kind: input, shape index: {}]   ;;  %s1441_s7 = inlined_call_operand.vmem [shape: f32[4,32], index: 7, kind: input, shape index: {}]   ;;  %s1442_s8 = inlined_call_operand.vmem [shape: f32[32,32], index: 8, kind: input, shape index: {}]   ;;  %s1443_s9 = inlined_call_operand.vmem [shape: f32[1,32], index: 9, kind: input, shape index: {}]   ;;  %s1444_s10 = inlined_call_operand.vmem [shape: f32[1,32], index: 10, kind: input, shape index: {}]   ;;  %s1445_s11 = inlined_call_operand.vmem [shape: f32[1,32], index: 11, kind: input, shape index: {}]   ;;  %s1446_s12 = inlined_call_operand.hbm [shape: f32[32,64], index: 12, kind: input, shape index: {}]   ;;  %s1447_s13 = inlined_call_operand.vmem [shape: f32[1,64], index: 13, kind: input, shape index: {}]   ;;  %s1448_s14 = inlined_call_operand.vmem [shape: f32[64,32], index: 14, kind: input, shape index: {}]   ;;  %s1449_s15 = inlined_call_operand.vmem [shape: f32[1,32], index: 15, kind: input, shape index: {}]   ;;  %s1450_s16 = inlined_call_operand.vmem [shape: f32[1,32], index: 16, kind: input, shape index: {}]   ;;  %s1451_s17 = inlined_call_operand.vmem [shape: f32[1,32], index: 17, kind: input, shape index: {}]   ;;  %s1452_s18 = inlined_call_operand.hbm [shape: f32[2,32], index: 18, kind: output, shape index: {0}]   ;;  %s1453_s19 = inlined_call_operand.hbm [shape: f32[4,16], index: 19, kind: output, shape index: {1}]  }
   0x1   :  { %1456 = sst [smem:[#allocation11_spill]] %s1434_s0 }
   0x2   :  { %1457 = sst [smem:[#allocation12_spill]] %s1435_s1 }
   0x3   :  { %1458 = sst [smem:[#allocation13_spill]] %s1436_s2 }
   0x4   :  { %1459 = sst [smem:[#allocation14_spill]] %s1437_s3 }
   0x5   :  { %25 = vsyncpa [#allocation3], 0 }
   0x6   :  { %26 = vsyncpa [#allocation4], 0 }
   0x7   :  { %27 = vsyncpa [#allocation7], 0  ;;  %s1145_s0 = smov [#allocation2]  }
   0x8   :  { %s57_s30 = sshll.u32 %s1145_s0, 4  ;;  %s58_s30 = int_to_ptr.vmem [resolvable:$true] %s57_s30 }
   0x9   :  { %s1087_s20 = scalar_lea.vmem %s58_s30, 512  ;;  %p1092_p1 = scmp.lt.s32.totalorder %s58_s30, %s58_s30 }
   0xa   :  { %p1088_p0 = scmp.ne.s32.totalorder %s58_s30, %s1087_s20  ;;  %p1093_p2 = scmp.lt.s32.totalorder %s1087_s20, %s1087_s20 }
   0xc   :  { %p1094_p3 = por %p1093_p2, %p1092_p1 }
   0xe   :  { %p1095_p4 = pnand %p1094_p3, %p1088_p0 }
  0x10   :  { %1098 = shalt.err (!%p1095_p4)
}
  0x11   :  { %s1146_s21 = smov 128   ;;  %s1147_s1 = smov 8  }
  0x12   :  { %63 = dma.hbm_to_vmem [thread:$0]  %s1446_s12, 512, %s58_s30, [#allocation3], %s1146_s21, %s1146_s21, %s1147_s1  }
  0x13   :  { %1139 = dma.done.wait [#allocation3], 512  }
  0x14   :  { %1140 = vsyncadd [#allocation3], 4294966784  ;;  %v1148_v0 = vmov 0.0   ;;  %vm1149_vm0 = vmmov 0   ;;  %s1460_s25 = sld [smem:[#allocation13_spill]]  ;;  %vm91_vm1 = vcmask 261120   ;;  %v262_v18 = vlaneseq }
  0x15   :  { %979 = vmatprep.subr.mxu0 %v1148_v0  ;;  %987 = vmatprep.mubr.msk.f32.mxu0 %vm1149_vm0, %v1148_v0  ;;  %s1461_s20 = sld [smem:[#allocation12_spill]]  ;;  %v168_v6 = vld [vmem:[%s1438_s4 + $0x18] sm:$0xff]  ;;  %v167_v8 = vld [vmem:[%s1438_s4 + $0x10] sm:$0xff]  ;;  %v166_v9 = vld [vmem:[%s1438_s4 + $0x8] sm:$0xff]  ;;  %v1150_v16 = vmov 1966171168  }
  0x16   :  { %s1462_s23 = sld [smem:[#allocation11_spill]]  ;;  %v165_v10 = vld [vmem:[%s1438_s4] sm:$0xff]  ;;  %v296_v12 = vld [vmem:[%s1440_s6 + $0x18] sm:$0xff]  ;;  %v295_v13 = vld [vmem:[%s1440_s6 + $0x10] sm:$0xff]  ;;  %v260_v17 = vunpack.c.l.s4 %v1150_v16  ;;  %v263_v20 = vshrl.u32 %v262_v18, 7  ;;  %s1151_s26 = smov 96  }
  0x17   :  { %v294_v14 = vld [vmem:[%s1440_s6 + $0x8] sm:$0xff]  ;;  %v293_v15 = vld [vmem:[%s1440_s6] sm:$0xff]  ;;  %vm430_vm2 = vcmask 1043456   ;;  %vm378_vm3 = vcmask 31744   ;;  %vm546_vm4 = vcmask 1041409   ;;  %vm623_vm5 = vcmask 254976  }
  0x18   :  { %v261_v19 = vunpack.c.0.s8 %v260_v17  ;;  %v283_v28 = vsub.s32 0, %v263_v20  ;;  %v922_v32 = vld [vmem:[%s1439_s5] ss:$0 sm:$0xff]  ;;  %vm752_vm6 = vcmask 523264   ;;  %s1152_s1 = smov [#allocation5]  }
  0x19   :  { %v423_v41 = vld [vmem:[%s1441_s7] sm:$0xf]  ;;  %s897_s22 = sshll.u32 %s1152_s1, 4  ;;  %s898_s22 = int_to_ptr.vmem [resolvable:$true] %s897_s22 }
  0x1a   :  { %v83_v1 = vld [vmem:[%s1460_s25 + $0x18] sm:$0xff]  ;;  %v82_v2 = vld [vmem:[%s1460_s25 + $0x10] sm:$0xff]  ;;  %v81_v3 = vld [vmem:[%s1460_s25 + $0x8] sm:$0xff]  ;;  %v264_v24 = vsub.s32 %v261_v19, %v263_v20  ;;  %1012 = vmatprep.subr.msk.mxu1 %vm430_vm2, %v423_v41  ;;  %s1099_s2 = scalar_lea.vmem %s898_s22, 32  ;;  %p1104_p6 = scmp.lt.s32.totalorder %s898_s22, %s898_s22 }
  0x1b   :  { %980 = vmatpush3.msra.mxu0 %v83_v1  ;;  %v80_v4 = vld [vmem:[%s1460_s25] sm:$0xff]  ;;  %s1463_s25 = sld [smem:[#allocation14_spill]]  ;;  %1013 = vmatpush3.msk.msra.mxu1 %vm430_vm2, %v423_v41  ;;  %p1100_p5 = scmp.ne.s32.totalorder %s898_s22, %s1099_s2 }
  0x1c   :  { %981 = vmatprep.subr.mxu0 %v1148_v0  ;;  %v1277_v5 = vld [vmem:[%s1461_s20] sm:$0x3]  ;;  %v78_v11 = vld [vmem:[%s1462_s23 + $0x8] sm:$0xff]  ;;  %1017 = vmatprep.subr.mxu1 %v1148_v0  ;;  %p1105_p7 = scmp.lt.s32.totalorder %s1099_s2, %s1099_s2 }
  0x1d   :  { %982 = vmatpush3.msra.mxu0 %v82_v2  ;;  %v77_v7 = vld [vmem:[%s1462_s23] sm:$0xff] }
  0x1e   :  { %983 = vmatprep.subr.mxu0 %v1148_v0  ;;  %p1106_p8 = por %p1105_p7, %p1104_p6 }
  0x1f   :  { %984 = vmatpush3.msra.mxu0 %v81_v3 }
  0x20   :  { %985 = vmatprep.subr.mxu0 %v1148_v0  ;;  %p1107_p9 = pnand %p1106_p8, %p1100_p5 }
  0x21   :  { %986 = vmatpush3.msra.mxu0 %v80_v4  ;;  %v920_v21 = vld [vmem:[%s1463_s25] ss:$0 sm:$0xff] }
  0x22   :  { %988 = vmatmul.mubr.msk.f32.vlgmr.msra.gmra.mxu0 %vm91_vm1, %v1277_v5  ;;  %990 = vmatprep.subr.mxu0 %v168_v6 }
  0x23   :  { %991 = vmatpush3.msra.mxu0 %v168_v6  ;;  %998 = vmatprep.mubr.msk.f32.mxu0 %vm91_vm1, %v77_v7 }
  0x24   :  { %992 = vmatprep.subr.mxu0 %v167_v8 }
  0x25   :  { %993 = vmatpush3.msra.mxu0 %v167_v8 }
  0x26   :  { %994 = vmatprep.subr.mxu0 %v166_v9 }
  0x27   :  { %995 = vmatpush3.msra.mxu0 %v166_v9 }
  0x28   :  { %996 = vmatprep.subr.mxu0 %v165_v10 }
  0x29   :  { %997 = vmatpush3.msra.mxu0 %v165_v10 }
  0x2a   :  { %999 = vmatmul.mubr.msk.f32.vlgmr.msra.gmra.mxu0 %vm91_vm1, %v78_v11  ;;  %1001 = vmatprep.subr.mxu0 %v296_v12 }
  0x2b   :  { %1002 = vmatpush3.msra.mxu0 %v296_v12 }
  0x2c   :  { %1003 = vmatprep.subr.mxu0 %v295_v13 }
  0x2d   :  { %1004 = vmatpush3.msra.mxu0 %v295_v13 }
  0x2e   :  { %1005 = vmatprep.subr.mxu0 %v294_v14 }
  0x2f   :  { %1006 = vmatpush3.msra.mxu0 %v294_v14 }
  0x30   :  { %1007 = vmatprep.subr.mxu0 %v293_v15 }
  0x31   :  { %1008 = vmatpush3.msra.mxu0 %v293_v15 }
  0x32   :  { %1028 = vmatprep.subr.mxu0 %v1148_v0 }
  0xe2   :  { %v161_v22 = vpop.f32.mrf.mxu0 }
  0xe3   :  { %v162_v23 = vadd.f32 %v920_v21, %v161_v22 }
  0xe4   :  { %v989_v25 = vpop.f32.mrf.mxu0 }
  0xe5   :  { %v257_v26 = vmul.f32 0.35355338, %v162_v23 }
  0xe7   :  { %v265_v27 = vrot.slane %v257_v26, %v264_v24  ;;  %v536_v26 = vld [vmem:[%s1442_s8 + $0x18] sm:$0xff] }
  0xe9   :  { %v266_v29 = vcombine.high %v265_v27, %v265_v27  ;;  %v273_v30 = vrot.slane %v265_v27, %v264_v24  ;;  %v535_v27 = vld [vmem:[%s1442_s8 + $0x10] sm:$0xff] }
  0xea   :  { %v1000_v31 = vpop.f32.mrf.mxu0 }
  0xeb   :  { %v280_v33 = vrot.slane %v266_v29, %v264_v24  ;;  %v284_v34 = vrot.slane %v273_v30, %v283_v28  ;;  %v254_v36 = vadd.f32 %v1000_v31, %v922_v32  ;;  %v533_v29 = vld [vmem:[%s1442_s8] sm:$0xff] }
  0xec   :  { %v248_v35 = vpop.f32.mrf.mxu0 }
  0xed   :  { %v288_v37 = vrot.slane %v280_v33, %v283_v28  ;;  %v249_v38 = vadd.f32 %v922_v32, %v248_v35  ;;  %v534_v28 = vld [vmem:[%s1442_s8 + $0x8] sm:$0xff] }
  0xef   :  { %v292_v39 = vmul.f32 %v288_v37, %v254_v36  ;;  %v291_v40 = vmul.f32 %v284_v34, %v249_v38  ;;  %511 = vrot.lane.b32.xlu0 %v249_v38, %s1151_s26 }
  0xf1   :  { %1009 = vmatprep.mubr.msk.f32.mxu0 %vm91_vm1, %v291_v40 }
  0xf2   :  { %1010 = vmatmul.mubr.msk.f32.vlgmr.msra.gmra.mxu0 %vm91_vm1, %v292_v39 }
  0xf3   :  { %513 = vrot.lane.b32.xlu0 %v254_v36, %s1151_s26  ;;  %1036 = vmatprep.mubr.msk.f32.mxu0 %vm1149_vm0, %v1148_v0 }
 0x161   :  { %v512_v30 = vpop.permute.xlu0 %511 }
 0x165   :  { %v514_v31 = vpop.permute.xlu0 %513 }
 0x1b2   :  { %v1011_v42 = vpop.f32.mrf.mxu0 }
 0x1b3   :  { %v386_v43 = vsel %vm378_vm3, %v1011_v42, -inf }
 0x1b4   :  { %v387_v44 = vrot.slane %v386_v43, 4  ;;  %v369_v45 = vpop.f32.mrf.mxu0 }
 0x1b5   :  { %v379_v46 = vsel %vm378_vm3, %v369_v45, -inf }
 0x1b6   :  { %v388_v47 = vmax.f32 %v386_v43, %v387_v44  ;;  %v380_v48 = vrot.slane %v379_v46, 4 }
 0x1b8   :  { %v389_v49 = vrot.slane %v388_v47, 2  ;;  %v381_v50 = vmax.f32 %v379_v46, %v380_v48 }
 0x1ba   :  { %v390_v51 = vmax.f32 %v388_v47, %v389_v49  ;;  %v382_v52 = vrot.slane %v381_v50, 2 }
 0x1bc   :  { %v391_v53 = vrot.slane %v390_v51, 1  ;;  %v383_v54 = vmax.f32 %v381_v50, %v382_v52 }
 0x1be   :  { %v392_v55 = vmax.f32 %v390_v51, %v391_v53  ;;  %v384_v56 = vrot.slane %v383_v54, 1  ;;  %v930_v51 = vld [vmem:[%s1443_s9] ss:$0 sm:$0xff] }
 0x1c0   :  { %v394_v57 = vsub.f32 %v1011_v42, %v392_v55  ;;  %v385_v58 = vmax.f32 %v383_v54, %v384_v56 }
 0x1c2   :  { %v397_v59 = vmul.f32 1.442695, %v394_v57  ;;  %v393_v60 = vsub.f32 %v369_v45, %v385_v58 }
 0x1c4   :  { %1067 = vpow2.f32 %v397_v59  ;;  %v395_v61 = vmul.f32 1.442695, %v393_v60 }
 0x1c6   :  { %1069 = vpow2.f32 %v395_v61 }
 0x1d1   :  { %v1068_v62 = vpop.eup %1067 }
 0x1d2   :  { %v406_v63 = vsel %vm378_vm3, %v1068_v62, 0.0 }
 0x1d3   :  { %v1070_v1 = vpop.eup %1069  ;;  %v407_v2 = vrot.slane %v406_v63, 4 }
 0x1d4   :  { %v399_v3 = vsel %vm378_vm3, %v1070_v1, 0.0 }
 0x1d5   :  { %v408_v4 = vadd.f32 %v407_v2, %v406_v63  ;;  %v400_v6 = vrot.slane %v399_v3, 4  ;;  %v654_v63 = vld [vmem:[#allocation2 + $0x10] sm:$0xff]  ;;  %v744_v2 = vld [vmem:[%s1448_s14 + $0x38] sm:$0xff] }
 0x1d7   :  { %v401_v7 = vadd.f32 %v400_v6, %v399_v3  ;;  %v409_v8 = vrot.slane %v408_v4, 2  ;;  %v743_v3 = vld [vmem:[%s1448_s14 + $0x30] sm:$0xff]  ;;  %v741_v6 = vld [vmem:[%s1448_s14 + $0x20] sm:$0xff] }
 0x1d9   :  { %v402_v9 = vrot.slane %v401_v7, 2  ;;  %v410_v10 = vadd.f32 %v409_v8, %v408_v4  ;;  %v742_v4 = vld [vmem:[%s1448_s14 + $0x28] sm:$0xff] }
 0x1db   :  { %v403_v11 = vadd.f32 %v402_v9, %v401_v7  ;;  %v411_v12 = vrot.slane %v410_v10, 1  ;;  %v740_v7 = vld [vmem:[%s1448_s14 + $0x18] sm:$0xff] }
 0x1dd   :  { %v404_v13 = vrot.slane %v403_v11, 1  ;;  %v412_v14 = vadd.f32 %v411_v12, %v410_v10  ;;  %v932_v12 = vld [vmem:[%s1444_s10] ss:$0 sm:$0xff] }
 0x1df   :  { %v405_v15 = vadd.f32 %v404_v13, %v403_v11  ;;  %1071 = vrcp.f32 %v412_v14 }
 0x1e1   :  { %1073 = vrcp.f32 %v405_v15 }
 0x1ec   :  { %v1072_v16 = vpop.eup %1071 }
 0x1ed   :  { %v416_v17 = vmul.f32 %v1072_v16, %v412_v14  ;;  %v933_v14 = vld [vmem:[%s1445_s11] ss:$0 sm:$0xff] }
 0x1ee   :  { %v1074_v18 = vpop.eup %1073 }
 0x1ef   :  { %v415_v19 = vmul.f32 %v1074_v18, %v405_v15  ;;  %v418_v20 = vsub.f32 2.0, %v416_v17  ;;  %v739_v17 = vld [vmem:[%s1448_s14 + $0x10] sm:$0xff] }
 0x1f1   :  { %v417_v21 = vsub.f32 2.0, %v415_v19  ;;  %v420_v22 = vmul.f32 %v1072_v16, %v418_v20  ;;  %v737_v19 = vld [vmem:[%s1448_s14] sm:$0xff] }
 0x1f2   :  { %v934_v20 = vld [vmem:[%s1447_s13] ss:$0 sm:$0xff] }
 0x1f3   :  { %v419_v23 = vmul.f32 %v1074_v18, %v417_v21  ;;  %v1335_v25 = vmul.f32 %v1068_v62, %v420_v22  ;;  %v655_v62 = vld [vmem:[#allocation2 + $0x18] sm:$0xff]  ;;  %v738_v18 = vld [vmem:[%s1448_s14 + $0x8] sm:$0xff] }
 0x1f4   :  { %1029 = vmatpush3.msra.mxu0 %v655_v62 }
 0x1f5   :  { %v1333_v24 = vmul.f32 %v1070_v1, %v419_v23  ;;  %1030 = vmatprep.subr.mxu0 %v1148_v0  ;;  %v653_v1 = vld [vmem:[#allocation2 + $0x8] sm:$0xff] }
 0x1f6   :  { %1031 = vmatpush3.msra.mxu0 %v654_v63 }
 0x1f7   :  { %1014 = vmatprep.mubr.msk.f32.mxu1 %vm378_vm3, %v1333_v24  ;;  %1032 = vmatprep.subr.mxu0 %v1148_v0 }
 0x1f8   :  { %1015 = vmatmul.mubr.msk.f32.vlgmr.msra.gmra.mxu1 %vm378_vm3, %v1335_v25  ;;  %1033 = vmatpush3.msra.mxu0 %v653_v1 }
 0x1f9   :  { %1025 = vmatprep.mubr.msk.f32.mxu1 %vm1149_vm0, %v1148_v0  ;;  %1018 = vmatpush3.msra.mxu1 %v536_v26 }
 0x1fa   :  { %1019 = vmatprep.subr.mxu1 %v1148_v0  ;;  %1034 = vmatprep.subr.mxu0 %v1148_v0 }
 0x1fb   :  { %1020 = vmatpush3.msra.mxu1 %v535_v27  ;;  %v936_v27 = vld [vmem:[%s1449_s15] ss:$0 sm:$0xff] }
 0x1fc   :  { %1021 = vmatprep.subr.mxu1 %v1148_v0 }
 0x1fd   :  { %1022 = vmatpush3.msra.mxu1 %v534_v28 }
 0x1fe   :  { %1023 = vmatprep.subr.mxu1 %v1148_v0 }
 0x1ff   :  { %1024 = vmatpush3.msra.mxu1 %v533_v29 }
 0x200   :  { %1039 = vmatprep.subr.mxu1 %v1148_v0 }
 0x2b8   :  { %v1016_v32 = vpop.f32.mrf.mxu1 }
 0x2b9   :  { %v518_v33 = vmul.f32 %v1016_v32, %v514_v31 }
 0x2ba   :  { %v500_v34 = vpop.f32.mrf.mxu1 }
 0x2bb   :  { %v526_v35 = vsel %vm91_vm1, %v518_v33, 0.0  ;;  %v517_v36 = vmul.f32 %v512_v30, %v500_v34 }
 0x2bc   :  { %v527_v37 = vrot.slane %v526_v35, 4 }
 0x2bd   :  { %v519_v38 = vsel %vm91_vm1, %v517_v36, 0.0 }
 0x2be   :  { %v528_v39 = vadd.f32 %v527_v37, %v526_v35  ;;  %v520_v40 = vrot.slane %v519_v38, 4 }
 0x2c0   :  { %v529_v41 = vrot.slane %v528_v39, 2  ;;  %v521_v42 = vadd.f32 %v520_v40, %v519_v38 }
 0x2c2   :  { %v530_v43 = vadd.f32 %v529_v41, %v528_v39  ;;  %v522_v44 = vrot.slane %v521_v42, 2  ;;  %v938_v41 = vld [vmem:[%s1450_s16] ss:$0 sm:$0xff] }
 0x2c4   :  { %v531_v45 = vrot.slane %v530_v43, 1  ;;  %v523_v46 = vadd.f32 %v522_v44, %v521_v42 }
 0x2c6   :  { %v524_v47 = vrot.slane %v523_v46, 1  ;;  %v532_v48 = vadd.f32 %v531_v45, %v530_v43  ;;  %v939_v43 = vld [vmem:[%s1451_s17] ss:$0 sm:$0xff] }
 0x2c8   :  { %v525_v49 = vadd.f32 %v524_v47, %v523_v46 }
 0x2ca   :  { %v547_v50 = vsel %vm546_vm4, %v532_v48, %v525_v49 }
 0x2cb   :  { %1026 = vmatmul.mubr.msk.f32.vlgmr.msra.gmra.mxu1 %vm91_vm1, %v547_v50 }
 0x2cc   :  { %1055 = vmatprep.mubr.msk.f32.mxu1 %vm1149_vm0, %v1148_v0  ;;  %1040 = vmatpush3.msra.mxu1 %v744_v2 }
 0x2cd   :  { %1041 = vmatprep.subr.mxu1 %v1148_v0 }
 0x2ce   :  { %1042 = vmatpush3.msra.mxu1 %v743_v3 }
 0x2cf   :  { %1043 = vmatprep.subr.mxu1 %v1148_v0 }
 0x2d0   :  { %1044 = vmatpush3.msra.mxu1 %v742_v4 }
 0x2d1   :  { %1045 = vmatprep.subr.mxu1 %v1148_v0 }
 0x2d2   :  { %1046 = vmatpush3.msra.mxu1 %v741_v6 }
 0x2d3   :  { %1047 = vmatprep.subr.mxu1 %v1148_v0 }
 0x2d4   :  { %1048 = vmatpush3.msra.mxu1 %v740_v7 }
 0x2d5   :  { %1049 = vmatprep.subr.mxu1 %v1148_v0 }
 0x2d6   :  { %1050 = vmatpush3.msra.mxu1 %v739_v17 }
 0x2d7   :  { %1051 = vmatprep.subr.mxu1 %v1148_v0 }
 0x2d8   :  { %1052 = vmatpush3.msra.mxu1 %v738_v18 }
 0x2d9   :  { %1053 = vmatprep.subr.mxu1 %v1148_v0 }
 0x2da   :  { %1054 = vmatpush3.msra.mxu1 %v737_v19 }
 0x38b   :  { %v616_v52 = vpop.f32.mrf.mxu1 }
 0x38c   :  { %v617_v53 = vadd.f32 %v930_v51, %v616_v52 }
 0x38d   :  { %v1027_v54 = vpop.f32.mrf.mxu1 }
 0x38e   :  { %v620_v55 = vadd.f32 %v617_v53, %v1277_v5  ;;  %v652_v5 = vld [vmem:[#allocation2] sm:$0xff] }
 0x38f   :  { %1035 = vmatpush3.msra.mxu0 %v652_v5 }
 0x390   :  { %v624_v56 = vsel %vm623_vm5, %v620_v55, 0.0 }
 0x391   :  { %625 = vadd.xlane.f32.xlu1 %v624_v56 }
 0x41a   :  { %v626_v57 = vpop.xlane.xlu1 %625 }
 0x41b   :  { %v628_v58 = vmul.f32 0.03125, %v626_v57 }
 0x41d   :  { %v629_v59 = vsub.f32 %v620_v55, %v628_v58 }
 0x41f   :  { %v630_v60 = vmul.f32 %v629_v59, %v629_v59 }
 0x421   :  { %v631_v61 = vsel %vm623_vm5, %v630_v60, 0.0 }
 0x422   :  { %632 = vadd.xlane.f32.xlu1 %v631_v61 }
 0x4ab   :  { %v633_v8 = vpop.xlane.xlu1 %632 }
 0x4ac   :  { %v634_v9 = vmul.f32 0.03125, %v633_v8 }
 0x4ae   :  { %v635_v10 = vadd.f32 1e-05, %v634_v9 }
 0x4b0   :  { %1075 = vrsqrt.f32 %v635_v10 }
 0x4bd   :  { %v1076_v11 = vpop.eup %1075 }
 0x4be   :  { %v637_v13 = vmul.f32 %v1076_v11, %v629_v59 }
 0x4c0   :  { %v644_v15 = vmul.f32 %v932_v12, %v637_v13 }
 0x4c2   :  { %v651_v16 = vadd.f32 %v933_v14, %v644_v15 }
 0x4c4   :  { %1037 = vmatmul.mubr.msk.f32.vlgmr.msra.gmra.mxu0 %vm91_vm1, %v651_v16 }
 0x584   :  { %v732_v21 = vpop.f32.mrf.mxu0 }
 0x585   :  { %v733_v22 = vadd.f32 %v934_v20, %v732_v21 }
 0x586   :  { %v1038_v23 = vpop.f32.mrf.mxu0 }
 0x587   :  { %v736_v26 = vmax.f32 %v733_v22, 0.0 }
 0x589   :  { %1056 = vmatmul.mubr.msk.f32.vlgmr.msra.gmra.mxu1 %vm752_vm6, %v736_v26 }
 0x649   :  { %v822_v0 = vpop.f32.mrf.mxu1 }
 0x64a   :  { %v823_v28 = vadd.f32 %v936_v27, %v822_v0 }
 0x64b   :  { %v1057_v29 = vpop.f32.mrf.mxu1 }
 0x64c   :  { %v826_v30 = vadd.f32 %v823_v28, %v651_v16 }
 0x64e   :  { %v829_v31 = vsel %vm623_vm5, %v826_v30, 0.0 }
 0x64f   :  { %830 = vadd.xlane.f32.xlu0 %v829_v31 }
 0x6d8   :  { %v831_v32 = vpop.xlane.xlu0 %830 }
 0x6d9   :  { %v832_v33 = vmul.f32 0.03125, %v831_v32 }
 0x6db   :  { %v833_v34 = vsub.f32 %v826_v30, %v832_v33 }
 0x6dd   :  { %v834_v35 = vmul.f32 %v833_v34, %v833_v34 }
 0x6df   :  { %v835_v36 = vsel %vm623_vm5, %v834_v35, 0.0 }
 0x6e0   :  { %836 = vadd.xlane.f32.xlu1 %v835_v36 }
 0x713   :  { %857 = vxpose.xlu1.b32.start [1/2] (short) (narrow) %v1333_v24, 8 }
 0x717   :  { %858 = vxpose.xlu1.b32.end [2/2] (short) (narrow) %v1335_v25, 8 }
 0x769   :  { %v837_v37 = vpop.xlane.xlu1 %836 }
 0x76a   :  { %v838_v38 = vmul.f32 0.03125, %v837_v37 }
 0x76c   :  { %v839_v39 = vadd.f32 1e-05, %v838_v38 }
 0x76e   :  { %1077 = vrsqrt.f32 %v839_v39 }
 0x77b   :  { %v1078_v40 = vpop.eup %1077 }
 0x77c   :  { %v841_v42 = vmul.f32 %v1078_v40, %v833_v34 }
 0x77e   :  { %v848_v44 = vmul.f32 %v938_v41, %v841_v42 }
 0x780   :  { %v855_v24 = vadd.f32 %v939_v43, %v848_v44 }
 0x782   :  { %856 = vst.msk [vmem:[#allocation5] sm:$0x3] %vm623_vm5, %v855_v24 }
 0x783   :  { %1110 = shalt.err (!%p1107_p9)
}
 0x784   :  { %900 = dma.vmem_to_hbm [thread:$0]  %s898_s22, 32, %s1452_s18, [#allocation4]   ;;  %vm889_vm7 = vcmask 125952  }
 0x785   :  { %s1153_s24 = smov [#allocation6]  }
 0x786   :  { %s907_s17 = sshll.u32 %s1153_s24, 4  ;;  %s908_s17 = int_to_ptr.vmem [resolvable:$true] %s907_s17 }
 0x787   :  { %s1119_s25 = scalar_lea.vmem %s908_s17, 64  ;;  %p1124_p11 = scmp.lt.s32.totalorder %s908_s17, %s908_s17 }
 0x788   :  { %p1120_p10 = scmp.ne.s32.totalorder %s908_s17, %s1119_s25  ;;  %p1125_p12 = scmp.lt.s32.totalorder %s1119_s25, %s1119_s25 }
 0x78a   :  { %p1126_p13 = por %p1125_p12, %p1124_p11 }
 0x78c   :  { %p1127_p0 = pnand %p1126_p13, %p1120_p10 }
 0x78f   :  { %v873_v25 = vpop.trf.xlu1 }
 0x790   :  { %890 = vst.msk [vmem:[#allocation6] sm:$0xf] %vm889_vm7, %v873_v25 }
 0x791   :  { %1130 = shalt.err (!%p1127_p0)
}
 0x792   :  { %910 = dma.vmem_to_hbm [thread:$0]  %s908_s17, 64, %s1453_s19, [#allocation7]  }
 0x793   :  { %1141 = dma.done.wait [#allocation4], 32  }
 0x794   :  { %1142 = vsyncadd [#allocation4], 4294967264 }
 0x795   :  { %1143 = dma.done.wait [#allocation7], 64  }
 0x796   :  { %1144 = vsyncadd [#allocation7], 4294967232 }
 0x797   :  { %917 = vsyncpa [#allocation3], 1 }
 0x798   :  { %918 = vsyncpa [#allocation4], 1 }
 0x799   :  { %919 = vsyncpa [#allocation7], 1 }

</bundles_post_ra>
